<compile_context>
chip_gen: v5e
topology: v5e:2x2
jax: 0.10.0
libtpu: 0.0.40
codegen_flags: <defaults>
</compile_context>

<pallas_src>
import jax
import jax.numpy as jnp
from jax.experimental import pallas as pl
from jax.experimental.pallas import tpu as pltpu


def _round_up(x, m):
    return (x + m - 1) // m * m


def _char_cnn_kernel(emb_ref, m_ref, b_ref, out_ref):
    # emb_ref: (TILE_N, W*E) bf16       m_ref: (W*E, n_t*C_PAD) bf16
    # b_ref:   (1, C_PAD)    f32        out_ref: (TILE_N, C_PAD) f32
    c_pad = out_ref.shape[1]
    n_t = m_ref.shape[1] // c_pad

    # One wide MXU matmul per tile: block-Toeplitz weight == conv at every time window.
    conv = jnp.dot(emb_ref[...], m_ref[...], preferred_element_type=jnp.float32)

    # Max-pool over time: static, 128-lane-aligned slices -> cheap views + VPU max.
    maxv = conv[:, 0:c_pad]
    for t in range(1, n_t):
        maxv = jnp.maximum(maxv, conv[:, t * c_pad:(t + 1) * c_pad])

    # Bias + ReLU hoisted after the max (relu(x + b) is monotone in x, so this is exact).
    out_ref[...] = jnp.maximum(maxv + b_ref[...], 0.0).astype(out_ref.dtype)


def character_embedding_forward(x, emb_table, conv_w, conv_b, *, tile_n=1024):
    """x: int32 [B, S, W]; emb_table: [V, E]; conv_w: [C, 1, E, KW]; conv_b: [C]."""
    B, S, Wl = x.shape
    V, E = emb_table.shape
    C, _, _, KW = conv_w.shape
    n_t = Wl - KW + 1
    C_pad = _round_up(C, 128)
    N = B * S

    # --- glue (XLA): embedding gather (padding_idx row is zero in the table), cast to
    #     bf16 for the MXU, flatten (chars x emb-dim) into one lane-dense axis.
    # TODO(synk): training-mode dropout(0.2) omitted; inference (identity) semantics.
    # TODO(synk): the gather could be fused in-kernel (one-hot matmul on char ids) to skip
    #     this bf16 [N, W*E] HBM round-trip; the kernel is dominated by the intrinsic
    #     conv+pool intermediate volume, so the gather stays in XLA for robustness.
    emb = emb_table.astype(jnp.bfloat16)[x].reshape(N, Wl * E)          # [N, W*E] bf16

    # --- block-Toeplitz conv operator [W*E, n_t*C_pad]:
    #     M[w*E+e, t*C_pad+c] = conv_w[c, 0, e, w-t] if 0 <= w-t < KW else 0.
    wk = jnp.transpose(conv_w[:, 0, :, :], (2, 1, 0)).astype(jnp.float32)   # (KW, E, C)
    m = jnp.zeros((Wl, E, n_t, C_pad), jnp.float32)
    for t in range(n_t):
        m = m.at[t:t + KW, :, t, :C].set(wk)
    m = m.reshape(Wl * E, n_t * C_pad).astype(jnp.bfloat16)
    b_pad = jnp.zeros((1, C_pad), jnp.float32).at[0, :C].set(conv_b.astype(jnp.float32))

    # --- tiling: large lane-dense tiles (multiple of 8); clamp for tiny inputs.
    tile_n = max(8, min(_round_up(tile_n, 8), _round_up(N, 8)))
    N_pad = _round_up(N, tile_n)
    if N_pad != N:
        emb = jnp.pad(emb, ((0, N_pad - N), (0, 0)))

    grid = (N_pad // tile_n,)
    out = pl.pallas_call(
        _char_cnn_kernel,
        out_shape=jax.ShapeDtypeStruct((N_pad, C_pad), jnp.float32),
        grid_spec=pltpu.PrefetchScalarGridSpec(
            num_scalar_prefetch=0,
            grid=grid,
            in_specs=[
                pl.BlockSpec((tile_n, Wl * E), lambda i: (i, 0)),         # activations
                pl.BlockSpec((Wl * E, n_t * C_pad), lambda i: (0, 0)),    # Toeplitz weight (resident)
                pl.BlockSpec((1, C_pad), lambda i: (0, 0)),               # bias (resident)
            ],
            out_specs=pl.BlockSpec((tile_n, C_pad), lambda i: (i, 0)),
        ),
        compiler_params=pltpu.CompilerParams(
            dimension_semantics=("parallel",),
        ),
    )(emb, m, b_pad)

    return out[:N, :C].reshape(B, S, C)


def _reference_forward(x, emb_table, conv_w, conv_b):
    """Pure-JAX f32 reference mirroring the PyTorch code (NCHW conv)."""
    B, S, Wl = x.shape
    E = emb_table.shape[1]
    C = conv_w.shape[0]
    emb = emb_table[x].astype(jnp.float32)                               # [B, S, W, E]
    inp = jnp.transpose(emb, (0, 1, 3, 2)).reshape(B * S, 1, E, Wl)      # NCHW
    out = jax.lax.conv_general_dilated(
        inp, conv_w.astype(jnp.float32), window_strides=(1, 1), padding="VALID",
        dimension_numbers=("NCHW", "OIHW", "NCHW"),
    )                                                                    # [N, C, 1, T]
    out = jnp.maximum(out + conv_b[None, :, None, None], 0.0)
    out = jnp.max(out, axis=3)[:, :, 0]                                  # max over time -> [N, C]
    return out.reshape(B, S, C)


if __name__ == "__main__":
    # small, deterministic setup
    VOCAB, E, C, KW = 32, 16, 100, 3    # kernel_size = (char_emb_dim, 3)
    B, S, Wl = 2, 6, 8

    key = jax.random.PRNGKey(0)
    k_emb, k_w, k_b, k_x = jax.random.split(key, 4)

    emb_table = 0.1 * jax.random.normal(k_emb, (VOCAB, E), dtype=jnp.float32)
    emb_table = emb_table.at[1].set(0.0)                                 # padding_idx=1 -> zero row
    conv_w = 0.1 * jax.random.normal(k_w, (C, 1, E, KW), dtype=jnp.float32)
    conv_b = 0.05 * jax.random.normal(k_b, (C,), dtype=jnp.float32)
    x = jax.random.randint(k_x, (B, S, Wl), 0, VOCAB, dtype=jnp.int32)

    out = character_embedding_forward(x, emb_table, conv_w, conv_b)
    out = jax.block_until_ready(out)

    ref = _reference_forward(x, emb_table, conv_w, conv_b)
    assert out.shape == (B, S, C), out.shape
    # bf16 MXU inputs (activations + Toeplitz weight) -> slightly looser tolerance than f32.
    max_err = float(jnp.max(jnp.abs(out - ref)))
    assert jnp.allclose(out, ref, atol=5e-3, rtol=5e-2), max_err

    print("KERNEL_OK")
</pallas_src>

<mosaic_0001>
module attributes {stable_mosaic.version = 11 : i64} {
  func.func @_char_cnn_kernel(%arg0: i32, %arg1: memref<16x128xbf16, #tpu.memory_space<vmem>>, %arg2: memref<128x768xbf16, #tpu.memory_space<vmem>>, %arg3: memref<1x128xf32, #tpu.memory_space<vmem>>, %arg4: memref<16x128xf32, #tpu.memory_space<vmem>>) attributes {dimension_semantics = [#tpu.dimension_semantics<parallel>], iteration_bounds = array<i64: 1>, scalar_prefetch = 0 : i64, scratch_operands = 0 : i64, tpu.core_type = #tpu.core_type<tc>, window_params = [{transform_indices = @transform_0, window_bounds = array<i64: 16, 128>}, {pipeline_mode = #tpu.pipeline_mode<synchronous>, transform_indices = @transform_1, window_bounds = array<i64: 128, 768>}, {pipeline_mode = #tpu.pipeline_mode<synchronous>, transform_indices = @transform_2, window_bounds = array<i64: 1, 128>}, {transform_indices = @transform_3, window_bounds = array<i64: 16, 128>}]} {
    %c0 = arith.constant 0 : index
    %c0_0 = arith.constant 0 : index
    %0 = vector.load %arg1[%c0, %c0_0] : memref<16x128xbf16, #tpu.memory_space<vmem>>, vector<16x128xbf16>
    %c0_1 = arith.constant 0 : index
    %c0_2 = arith.constant 0 : index
    %1 = vector.load %arg2[%c0_1, %c0_2] : memref<128x768xbf16, #tpu.memory_space<vmem>>, vector<128x768xbf16>
    %cst = arith.constant dense<0.000000e+00> : vector<16x768xf32>
    %2 = tpu.matmul %0, %1, %cst {dimension_numbers = #tpu.dot_dimension_numbers<[1], [0], [0], [1], [0, 0, 1, 1], [], []>} : vector<16x128xbf16>, vector<128x768xbf16>, vector<16x768xf32> -> vector<16x768xf32>
    %3 = vector.extract_strided_slice %2 {offsets = [0, 0], sizes = [16, 128], strides = [1, 1]} : vector<16x768xf32> to vector<16x128xf32>
    %4 = vector.extract_strided_slice %2 {offsets = [0, 128], sizes = [16, 128], strides = [1, 1]} : vector<16x768xf32> to vector<16x128xf32>
    %5 = arith.maximumf %3, %4 : vector<16x128xf32>
    %6 = vector.extract_strided_slice %2 {offsets = [0, 256], sizes = [16, 128], strides = [1, 1]} : vector<16x768xf32> to vector<16x128xf32>
    %7 = arith.maximumf %5, %6 : vector<16x128xf32>
    %8 = vector.extract_strided_slice %2 {offsets = [0, 384], sizes = [16, 128], strides = [1, 1]} : vector<16x768xf32> to vector<16x128xf32>
    %9 = arith.maximumf %7, %8 : vector<16x128xf32>
    %10 = vector.extract_strided_slice %2 {offsets = [0, 512], sizes = [16, 128], strides = [1, 1]} : vector<16x768xf32> to vector<16x128xf32>
    %11 = arith.maximumf %9, %10 : vector<16x128xf32>
    %12 = vector.extract_strided_slice %2 {offsets = [0, 640], sizes = [16, 128], strides = [1, 1]} : vector<16x768xf32> to vector<16x128xf32>
    %13 = arith.maximumf %11, %12 : vector<16x128xf32>
    %c0_3 = arith.constant 0 : index
    %c0_4 = arith.constant 0 : index
    %14 = vector.load %arg3[%c0_3, %c0_4] : memref<1x128xf32, #tpu.memory_space<vmem>>, vector<1x128xf32>
    %15 = vector.broadcast %14 : vector<1x128xf32> to vector<16x128xf32>
    %16 = arith.addf %13, %15 : vector<16x128xf32>
    %cst_5 = arith.constant 0.000000e+00 : f32
    %17 = vector.broadcast %cst_5 : f32 to vector<16x128xf32>
    %18 = arith.maximumf %16, %17 : vector<16x128xf32>
    %c0_6 = arith.constant 0 : index
    %c0_7 = arith.constant 0 : index
    %19 = vector.load %arg4[%c0_6, %c0_7] : memref<16x128xf32, #tpu.memory_space<vmem>>, vector<16x128xf32>
    tpu.vector_store %arg4[%c0_6, %c0_7], %18 {strides = array<i32>} : memref<16x128xf32, #tpu.memory_space<vmem>>, vector<16x128xf32>,
    return
  }
  func.func @transform_0(%arg0: i32) -> (i32, i32) {
    %c0_i32 = arith.constant 0 : i32
    %c0_i32_0 = arith.constant 0 : i32
    return %arg0, %c0_i32 : i32, i32
  }
  func.func @transform_1(%arg0: i32) -> (i32, i32) {
    %c0_i32 = arith.constant 0 : i32
    %c0_i32_0 = arith.constant 0 : i32
    %c0_i32_1 = arith.constant 0 : i32
    return %c0_i32, %c0_i32_0 : i32, i32
  }
  func.func @transform_2(%arg0: i32) -> (i32, i32) {
    %c0_i32 = arith.constant 0 : i32
    %c0_i32_0 = arith.constant 0 : i32
    %c0_i32_1 = arith.constant 0 : i32
    return %c0_i32, %c0_i32_0 : i32, i32
  }
  func.func @transform_3(%arg0: i32) -> (i32, i32) {
    %c0_i32 = arith.constant 0 : i32
    %c0_i32_0 = arith.constant 0 : i32
    return %arg0, %c0_i32 : i32, i32
  }
}

</mosaic_0001>

<bundles_post_ra>
// kernel: tpu_custom_call.1
= control target key start
LH: loop header
LB: loop body
LE: loop exit
PB: predicated region body
PF: predicated region fallthrough
CT: control target
= control target key end

     0   :  { %8 = vsyncpa [#allocation3], 0  ;;  %s841_s0 = inlined_call_operand.hbm [shape: bf16[16,128], index: 0, kind: input, shape index: {}]   ;;  %s842_s1 = inlined_call_operand.hbm [shape: bf16[128,768], index: 1, kind: input, shape index: {}]   ;;  %s843_s2 = inlined_call_operand.vmem [shape: f32[1,128], index: 2, kind: input, shape index: {}]   ;;  %s844_s3 = inlined_call_operand.hbm [shape: f32[16,128], index: 3, kind: output, shape index: {}]  }
   0x1   :  { %9 = vsyncpa [#allocation6], 0 }
   0x2   :  { %10 = vsyncpa [#allocation4], 0  ;;  %s15_s14 = sshll.u32 %s841_s0, 4  ;;  %s800_s15 = smov [#allocation2]   ;;  %s16_s14 = int_to_ptr.hbm [resolvable:$true] %s15_s14 }
   0x3   :  { %s17_s16 = sshll.u32 %s800_s15, 4  ;;  %s28_s19 = sshll.u32 %s842_s1, 4  ;;  %s18_s16 = int_to_ptr.vmem [resolvable:$true] %s17_s16  ;;  %s29_s19 = int_to_ptr.hbm [resolvable:$true] %s28_s19 }
   0x4   :  { %s801_s20 = smov 64   ;;  %s802_s21 = smov 4  }
   0x5   :  { %23 = dma.hbm_to_vmem [thread:$0]  %s16_s14, 128, %s18_s16, [#allocation3], %s801_s20, %s801_s20, %s802_s21  }
   0x6   :  { %s803_s22 = smov [#allocation5]   ;;  %s804_s24 = smov 384  }
   0x7   :  { %s30_s23 = sshll.u32 %s803_s22, 4  ;;  %s805_s25 = smov 24   ;;  %s31_s23 = int_to_ptr.vmem [resolvable:$true] %s30_s23 }
   0x8   :  { %36 = dma.hbm_to_vmem [thread:$0]  %s29_s19, 6144, %s31_s23, [#allocation6], %s804_s24, %s804_s24, %s805_s25  }
   0x9   :  { %794 = dma.done.wait [#allocation3], 128  }
   0xa   :  { %795 = vsyncadd [#allocation3], 4294967168 }
   0xb   :  { %796 = dma.done.wait [#allocation6], 6144  }
   0xc   :  { %797 = vsyncadd [#allocation6], 4294961152  ;;  %v641_v0 = vld [vmem:[#allocation5 + $0x150] sm:$0xf]  ;;  %v709_v1 = vld [vmem:[#allocation5 + $0x164] sm:$0xf0] }
   0xd   :  { %v706_v2 = vld [vmem:[#allocation5 + $0x154] sm:$0xf]  ;;  %v642_v3 = vor.u32 %v709_v1, %v641_v0  ;;  %v643_v4 = vld [vmem:[#allocation5 + $0x168] sm:$0xf0]  ;;  %v649_v5 = vld [vmem:[#allocation5 + $0x158] sm:$0xf] }
   0xe   :  { %v710_v6 = vld [vmem:[#allocation5 + $0x16c] sm:$0xf0]  ;;  %v646_v7 = vor.u32 %v706_v2, %v643_v4  ;;  %v707_v9 = vld [vmem:[#allocation5 + $0x15c] sm:$0xf]  ;;  %v651_v10 = vld [vmem:[#allocation5 + $0x170] sm:$0xf0] }
   0xf   :  { %v650_v8 = vor.u32 %v710_v6, %v649_v5  ;;  %v617_v11 = vld [vmem:[#allocation5 + $0x120] sm:$0xf]  ;;  %343 = vmatpush.bf16.msra.mxu0 %v642_v3  ;;  %v654_v12 = vor.u32 %v707_v9, %v651_v10  ;;  %v703_v13 = vld [vmem:[#allocation5 + $0x134] sm:$0xf0]  ;;  %v700_v14 = vld [vmem:[#allocation5 + $0x124] sm:$0xf] }
  0x10   :  { %v619_v15 = vld [vmem:[#allocation5 + $0x138] sm:$0xf0]  ;;  %357 = vmatpush.bf16.msra.mxu1 %v646_v7  ;;  %v618_v16 = vor.u32 %v703_v13, %v617_v11  ;;  %v625_v18 = vld [vmem:[#allocation5 + $0x128] sm:$0xf]  ;;  %v704_v19 = vld [vmem:[#allocation5 + $0x13c] sm:$0xf0] }
  0x11   :  { %371 = vmatpush.bf16.msra.mxu2 %v650_v8  ;;  %v622_v17 = vor.u32 %v700_v14, %v619_v15  ;;  %v701_v20 = vld [vmem:[#allocation5 + $0x12c] sm:$0xf]  ;;  %385 = vmatpush.bf16.msra.mxu3 %v654_v12  ;;  %v626_v21 = vor.u32 %v704_v19, %v625_v18  ;;  %v627_v22 = vld [vmem:[#allocation5 + $0x140] sm:$0xf0]  ;;  %v593_v23 = vld [vmem:[#allocation5 + $0xf0] sm:$0xf] }
  0x12   :  { %v697_v24 = vld [vmem:[#allocation5 + $0x104] sm:$0xf0]  ;;  %v630_v25 = vor.u32 %v701_v20, %v627_v22  ;;  %v694_v26 = vld [vmem:[#allocation5 + $0xf4] sm:$0xf]  ;;  %v595_v27 = vld [vmem:[#allocation5 + $0x108] sm:$0xf0] }
  0x13   :  { %v601_v28 = vld [vmem:[#allocation5 + $0xf8] sm:$0xf]  ;;  %344 = vmatpush.bf16.msra.mxu0 %v618_v16  ;;  %v594_v29 = vor.u32 %v697_v24, %v593_v23  ;;  %v698_v30 = vld [vmem:[#allocation5 + $0x10c] sm:$0xf0]  ;;  %v695_v31 = vld [vmem:[#allocation5 + $0xfc] sm:$0xf]  ;;  %v598_v33 = vor.u32 %v694_v26, %v595_v27 }
  0x14   :  { %v603_v32 = vld [vmem:[#allocation5 + $0x110] sm:$0xf0]  ;;  %358 = vmatpush.bf16.msra.mxu1 %v622_v17  ;;  %v602_v34 = vor.u32 %v698_v30, %v601_v28  ;;  %v569_v35 = vld [vmem:[#allocation5 + $0xc0] sm:$0xf]  ;;  %v691_v36 = vld [vmem:[#allocation5 + $0xd4] sm:$0xf0] }
  0x15   :  { %372 = vmatpush.bf16.msra.mxu2 %v626_v21  ;;  %v688_v37 = vld [vmem:[#allocation5 + $0xc4] sm:$0xf]  ;;  %386 = vmatpush.bf16.msra.mxu3 %v630_v25  ;;  %v606_v38 = vor.u32 %v695_v31, %v603_v32  ;;  %v571_v39 = vld [vmem:[#allocation5 + $0xd8] sm:$0xf0]  ;;  %v577_v40 = vld [vmem:[#allocation5 + $0xc8] sm:$0xf]  ;;  %v570_v44 = vor.u32 %v691_v36, %v569_v35 }
  0x16   :  { %v692_v41 = vld [vmem:[#allocation5 + $0xdc] sm:$0xf0]  ;;  %v689_v42 = vld [vmem:[#allocation5 + $0xcc] sm:$0xf]  ;;  %v579_v43 = vld [vmem:[#allocation5 + $0xe0] sm:$0xf0]  ;;  %v574_v45 = vor.u32 %v688_v37, %v571_v39 }
  0x17   :  { %345 = vmatpush.bf16.msra.mxu0 %v594_v29  ;;  %v578_v46 = vor.u32 %v692_v41, %v577_v40  ;;  %v545_v47 = vld [vmem:[#allocation5 + $0x90] sm:$0xf]  ;;  %v685_v48 = vld [vmem:[#allocation5 + $0xa4] sm:$0xf0]  ;;  %v682_v49 = vld [vmem:[#allocation5 + $0x94] sm:$0xf]  ;;  %v582_v50 = vor.u32 %v689_v42, %v579_v43 }
  0x18   :  { %359 = vmatpush.bf16.msra.mxu1 %v598_v33  ;;  %v547_v51 = vld [vmem:[#allocation5 + $0xa8] sm:$0xf0]  ;;  %v553_v52 = vld [vmem:[#allocation5 + $0x98] sm:$0xf]  ;;  %v686_v53 = vld [vmem:[#allocation5 + $0xac] sm:$0xf0]  ;;  %v546_v56 = vor.u32 %v685_v48, %v545_v47 }
  0x19   :  { %373 = vmatpush.bf16.msra.mxu2 %v602_v34  ;;  %387 = vmatpush.bf16.msra.mxu3 %v606_v38  ;;  %v683_v54 = vld [vmem:[#allocation5 + $0x9c] sm:$0xf]  ;;  %v555_v55 = vld [vmem:[#allocation5 + $0xb0] sm:$0xf0]  ;;  %v550_v57 = vor.u32 %v682_v49, %v547_v51  ;;  %v554_v58 = vor.u32 %v686_v53, %v553_v52  ;;  %v521_v59 = vld [vmem:[#allocation5 + $0x60] sm:$0xf] }
  0x1a   :  { %v679_v60 = vld [vmem:[#allocation5 + $0x74] sm:$0xf0]  ;;  %v676_v61 = vld [vmem:[#allocation5 + $0x64] sm:$0xf]  ;;  %v558_v62 = vor.u32 %v683_v54, %v555_v55  ;;  %v523_v63 = vld [vmem:[#allocation5 + $0x78] sm:$0xf0] }
  0x1b   :  { %346 = vmatpush.bf16.msra.mxu0 %v570_v44  ;;  %v529_v0 = vld [vmem:[#allocation5 + $0x68] sm:$0xf]  ;;  %v680_v1 = vld [vmem:[#allocation5 + $0x7c] sm:$0xf0]  ;;  %v677_v2 = vld [vmem:[#allocation5 + $0x6c] sm:$0xf]  ;;  %v522_v4 = vor.u32 %v679_v60, %v521_v59  ;;  %v526_v5 = vor.u32 %v676_v61, %v523_v63 }
  0x1c   :  { %360 = vmatpush.bf16.msra.mxu1 %v574_v45  ;;  %v531_v3 = vld [vmem:[#allocation5 + $0x80] sm:$0xf0]  ;;  %v530_v6 = vor.u32 %v680_v1, %v529_v0  ;;  %v497_v7 = vld [vmem:[#allocation5 + $0x30] sm:$0xf]  ;;  %v673_v8 = vld [vmem:[#allocation5 + $0x44] sm:$0xf0] }
  0x1d   :  { %374 = vmatpush.bf16.msra.mxu2 %v578_v46  ;;  %388 = vmatpush.bf16.msra.mxu3 %v582_v50  ;;  %v670_v9 = vld [vmem:[#allocation5 + $0x34] sm:$0xf]  ;;  %v534_v10 = vor.u32 %v677_v2, %v531_v3  ;;  %v499_v11 = vld [vmem:[#allocation5 + $0x48] sm:$0xf0]  ;;  %v505_v12 = vld [vmem:[#allocation5 + $0x38] sm:$0xf]  ;;  %v498_v16 = vor.u32 %v673_v8, %v497_v7 }
  0x1e   :  { %v674_v13 = vld [vmem:[#allocation5 + $0x4c] sm:$0xf0]  ;;  %v671_v14 = vld [vmem:[#allocation5 + $0x3c] sm:$0xf]  ;;  %v507_v15 = vld [vmem:[#allocation5 + $0x50] sm:$0xf0]  ;;  %v502_v18 = vor.u32 %v670_v9, %v499_v11 }
  0x1f   :  { %347 = vmatpush.bf16.msra.mxu0 %v546_v56  ;;  %v473_v17 = vld [vmem:[#allocation5] sm:$0xf]  ;;  %v506_v19 = vor.u32 %v674_v13, %v505_v12  ;;  %v667_v20 = vld [vmem:[#allocation5 + $0x14] sm:$0xf0]  ;;  %v664_v21 = vld [vmem:[#allocation5 + $0x4] sm:$0xf]  ;;  %v510_v23 = vor.u32 %v671_v14, %v507_v15 }
  0x20   :  { %361 = vmatpush.bf16.msra.mxu1 %v550_v57  ;;  %v475_v22 = vld [vmem:[#allocation5 + $0x18] sm:$0xf0]  ;;  %v481_v24 = vld [vmem:[#allocation5 + $0x8] sm:$0xf]  ;;  %v668_v25 = vld [vmem:[#allocation5 + $0x1c] sm:$0xf0]  ;;  %v474_v30 = vor.u32 %v667_v20, %v473_v17 }
  0x21   :  { %375 = vmatpush.bf16.msra.mxu2 %v554_v58  ;;  %389 = vmatpush.bf16.msra.mxu3 %v558_v62  ;;  %v657_v26 = vld [vmem:[#allocation5 + $0x160] sm:$0xf]  ;;  %v711_v27 = vld [vmem:[#allocation5 + $0x174] sm:$0xf0]  ;;  %v708_v28 = vld [vmem:[#allocation5 + $0x164] sm:$0xf]  ;;  %v478_v33 = vor.u32 %v664_v21, %v475_v22  ;;  %v482_v34 = vor.u32 %v668_v25, %v481_v24 }
  0x22   :  { %v659_v29 = vld [vmem:[#allocation5 + $0x178] sm:$0xf0]  ;;  %v665_v31 = vld [vmem:[#allocation5 + $0xc] sm:$0xf]  ;;  %v483_v32 = vld [vmem:[#allocation5 + $0x20] sm:$0xf0]  ;;  %v658_v35 = vor.u32 %v711_v27, %v657_v26 }
  0x23   :  { %348 = vmatpush.bf16.msra.mxu0 %v522_v4  ;;  %v662_v36 = vor.u32 %v708_v28, %v659_v29  ;;  %v633_v37 = vld [vmem:[#allocation5 + $0x130] sm:$0xf]  ;;  %v486_v38 = vor.u32 %v665_v31, %v483_v32  ;;  %v705_v39 = vld [vmem:[#allocation5 + $0x144] sm:$0xf0]  ;;  %v702_v40 = vld [vmem:[#allocation5 + $0x134] sm:$0xf] }
  0x24   :  { %362 = vmatpush.bf16.msra.mxu1 %v526_v5  ;;  %v635_v41 = vld [vmem:[#allocation5 + $0x148] sm:$0xf0]  ;;  %v663_v42 = vld [vmem:[#allocation2] sm:$0xff]  ;;  %v634_v43 = vor.u32 %v705_v39, %v633_v37  ;;  %v609_v45 = vld [vmem:[#allocation5 + $0x100] sm:$0xf]  ;;  %s806_s26 = smov [#allocation7]  }
  0x25   :  { %376 = vmatpush.bf16.msra.mxu2 %v530_v6  ;;  %390 = vmatpush.bf16.msra.mxu3 %v534_v10  ;;  %v638_v44 = vor.u32 %v702_v40, %v635_v41  ;;  %v699_v46 = vld [vmem:[#allocation5 + $0x114] sm:$0xf0]  ;;  %v696_v47 = vld [vmem:[#allocation5 + $0x104] sm:$0xf]  ;;  %v611_v48 = vld [vmem:[#allocation5 + $0x118] sm:$0xf0] }
  0x26   :  { %v610_v49 = vor.u32 %v699_v46, %v609_v45  ;;  %v614_v50 = vor.u32 %v696_v47, %v611_v48  ;;  %v585_v51 = vld [vmem:[#allocation5 + $0xd0] sm:$0xf]  ;;  %v693_v52 = vld [vmem:[#allocation5 + $0xe4] sm:$0xf0]  ;;  %v690_v53 = vld [vmem:[#allocation5 + $0xd4] sm:$0xf] }
  0x27   :  { %349 = vmatpush.bf16.msra.mxu0 %v498_v16  ;;  %v587_v54 = vld [vmem:[#allocation5 + $0xe8] sm:$0xf0]  ;;  %v586_v55 = vor.u32 %v693_v52, %v585_v51  ;;  %v561_v57 = vld [vmem:[#allocation5 + $0xa0] sm:$0xf]  ;;  %v687_v58 = vld [vmem:[#allocation5 + $0xb4] sm:$0xf0] }
  0x28   :  { %363 = vmatpush.bf16.msra.mxu1 %v502_v18  ;;  %v590_v56 = vor.u32 %v690_v53, %v587_v54  ;;  %v684_v59 = vld [vmem:[#allocation5 + $0xa4] sm:$0xf]  ;;  %v563_v60 = vld [vmem:[#allocation5 + $0xb8] sm:$0xf0]  ;;  %v562_v61 = vor.u32 %v687_v58, %v561_v57  ;;  %v537_v63 = vld [vmem:[#allocation5 + $0x70] sm:$0xf] }
  0x29   :  { %377 = vmatpush.bf16.msra.mxu2 %v506_v19  ;;  %391 = vmatpush.bf16.msra.mxu3 %v510_v23  ;;  %v566_v62 = vor.u32 %v684_v59, %v563_v60  ;;  %v681_v0 = vld [vmem:[#allocation5 + $0x84] sm:$0xf0]  ;;  %v678_v1 = vld [vmem:[#allocation5 + $0x74] sm:$0xf]  ;;  %v539_v2 = vld [vmem:[#allocation5 + $0x88] sm:$0xf0] }
  0x2a   :  { %v538_v3 = vor.u32 %v681_v0, %v537_v63  ;;  %v542_v4 = vor.u32 %v678_v1, %v539_v2  ;;  %v513_v5 = vld [vmem:[#allocation5 + $0x40] sm:$0xf]  ;;  %v675_v6 = vld [vmem:[#allocation5 + $0x54] sm:$0xf0]  ;;  %v672_v7 = vld [vmem:[#allocation5 + $0x44] sm:$0xf] }
  0x2b   :  { %350 = vmatpush.bf16.msra.mxu0 %v474_v30  ;;  %v515_v8 = vld [vmem:[#allocation5 + $0x58] sm:$0xf0]  ;;  %v514_v9 = vor.u32 %v675_v6, %v513_v5  ;;  %v489_v11 = vld [vmem:[#allocation5 + $0x10] sm:$0xf]  ;;  %v669_v12 = vld [vmem:[#allocation5 + $0x24] sm:$0xf0] }
  0x2c   :  { %364 = vmatpush.bf16.msra.mxu1 %v478_v33  ;;  %v518_v10 = vor.u32 %v672_v7, %v515_v8  ;;  %v666_v13 = vld [vmem:[#allocation5 + $0x14] sm:$0xf]  ;;  %v491_v14 = vld [vmem:[#allocation5 + $0x28] sm:$0xf0]  ;;  %v490_v15 = vor.u32 %v669_v12, %v489_v11  ;;  %v721_v31 = vld [vmem:[%s843_s2] ss:$0 sm:$0xff] }
  0x2d   :  { %378 = vmatpush.bf16.msra.mxu2 %v482_v34  ;;  %392 = vmatpush.bf16.msra.mxu3 %v486_v38  ;;  %v494_v16 = vor.u32 %v666_v13, %v491_v14  ;;  %s451_s27 = sshll.u32 %s806_s26, 4  ;;  %s453_s30 = sshll.u32 %s844_s3, 4  ;;  %s452_s27 = int_to_ptr.vmem [resolvable:$true] %s451_s27  ;;  %s454_s30 = int_to_ptr.hbm [resolvable:$true] %s453_s30 }
  0x2e   :  { %351 = vmatmul.bf16.vlgmr.msra.gmra.mxu0 %v663_v42  ;;  %s807_s2 = smov 128   ;;  %s808_s4 = smov 8  }
  0x2f   :  { %399 = vmatpush.bf16.msrb.mxu0 %v658_v35  ;;  %365 = vmatmul.bf16.vlgmr.msra.gmra.mxu1 %v663_v42 }
  0x30   :  { %413 = vmatpush.bf16.msrb.mxu1 %v662_v36  ;;  %379 = vmatmul.bf16.vlgmr.msra.gmra.mxu2 %v663_v42 }
  0x31   :  { %393 = vmatmul.bf16.vlgmr.msra.gmra.mxu3 %v663_v42 }
  0x33   :  { %400 = vmatpush.bf16.msrb.mxu0 %v634_v43 }
  0x34   :  { %414 = vmatpush.bf16.msrb.mxu1 %v638_v44 }
  0x37   :  { %401 = vmatpush.bf16.msrb.mxu0 %v610_v49 }
  0x38   :  { %415 = vmatpush.bf16.msrb.mxu1 %v614_v50 }
  0x3b   :  { %402 = vmatpush.bf16.msrb.mxu0 %v586_v55 }
  0x3c   :  { %416 = vmatpush.bf16.msrb.mxu1 %v590_v56 }
  0x3f   :  { %403 = vmatpush.bf16.msrb.mxu0 %v562_v61 }
  0x40   :  { %417 = vmatpush.bf16.msrb.mxu1 %v566_v62 }
  0x43   :  { %404 = vmatpush.bf16.msrb.mxu0 %v538_v3 }
  0x44   :  { %418 = vmatpush.bf16.msrb.mxu1 %v542_v4 }
  0x47   :  { %405 = vmatpush.bf16.msrb.mxu0 %v514_v9 }
  0x48   :  { %419 = vmatpush.bf16.msrb.mxu1 %v518_v10 }
  0x4b   :  { %406 = vmatpush.bf16.msrb.mxu0 %v490_v15 }
  0x4c   :  { %420 = vmatpush.bf16.msrb.mxu1 %v494_v16 }
  0x4e   :  { %407 = vmatmul.bf16.vlgmr.msrb.gmra.mxu0 %v663_v42 }
  0x4f   :  { %421 = vmatmul.bf16.vlgmr.msrb.gmra.mxu1 %v663_v42 }
  0xab   :  { %v352_v17 = vpop.f32.mrf.mxu0 }
  0xac   :  { %v366_v18 = vpop.f32.mrf.mxu1 }
  0xad   :  { %v427_v20 = vmax.f32 %v352_v17, %v366_v18 }
  0xb3   :  { %v380_v19 = vpop.f32.mrf.mxu2  ;;  %v354_v21 = vpop.f32.mrf.mxu0 }
  0xb4   :  { %v368_v22 = vpop.f32.mrf.mxu1  ;;  %v394_v23 = vpop.f32.mrf.mxu3  ;;  %v429_v24 = vmax.f32 %v427_v20, %v380_v19 }
  0xb5   :  { %v428_v26 = vmax.f32 %v354_v21, %v368_v22 }
  0xb6   :  { %v431_v25 = vmax.f32 %v429_v24, %v394_v23 }
  0xbb   :  { %v382_v27 = vpop.f32.mrf.mxu2 }
  0xbc   :  { %v430_v32 = vmax.f32 %v428_v26, %v382_v27  ;;  %v396_v34 = vpop.f32.mrf.mxu3 }
  0xbe   :  { %v432_v36 = vmax.f32 %v430_v32, %v396_v34 }
  0xcb   :  { %v408_v28 = vpop.f32.mrf.mxu0 }
  0xcc   :  { %v422_v29 = vpop.f32.mrf.mxu1  ;;  %v433_v30 = vmax.f32 %v431_v25, %v408_v28 }
  0xce   :  { %v435_v33 = vmax.f32 %v433_v30, %v422_v29 }
  0xd0   :  { %v441_v35 = vadd.f32 %v721_v31, %v435_v33 }
  0xd2   :  { %v443_v37 = vmax.f32 %v441_v35, 0.0 }
  0xd3   :  { %v410_v38 = vpop.f32.mrf.mxu0 }
  0xd4   :  { %445 = vst [vmem:[#allocation7] sm:$0xff] %v443_v37  ;;  %v434_v39 = vmax.f32 %v432_v36, %v410_v38  ;;  %v424_v40 = vpop.f32.mrf.mxu1 }
  0xd6   :  { %v436_v41 = vmax.f32 %v434_v39, %v424_v40 }
  0xd8   :  { %v442_v42 = vadd.f32 %v721_v31, %v436_v41 }
  0xda   :  { %v444_v43 = vmax.f32 %v442_v42, 0.0 }
  0xdc   :  { %446 = vst [vmem:[#allocation7 + $0x8] sm:$0xff] %v444_v43 }
  0xdd   :  { %459 = dma.vmem_to_hbm [thread:$0]  %s452_s27, 256, %s454_s30, [#allocation4], %s807_s2, %s807_s2, %s808_s4  }
  0xde   :  { %798 = dma.done.wait [#allocation4], 256  }
  0xdf   :  { %799 = vsyncadd [#allocation4], 4294967040 }
  0xe0   :  { %464 = vsyncpa [#allocation3], 1 }
  0xe1   :  { %465 = vsyncpa [#allocation6], 1 }
  0xe2   :  { %466 = vsyncpa [#allocation4], 1 }

</bundles_post_ra>
